<compile_context>
chip_gen: v5e
topology: v5e:2x2
jax: 0.10.0
libtpu: 0.0.40
codegen_flags: <defaults>
</compile_context>

<pallas_src>
import functools

import jax
import jax.numpy as jnp
from jax import lax
from jax.experimental import pallas as pl
from jax.experimental.pallas import tpu as pltpu


# ---------------------------------------------------------------------------
# Shared hash helpers (pure jnp -> usable both inside the kernel and in the
# small-count fast path, guaranteeing identical results for identical seeds).
# ---------------------------------------------------------------------------
def _hash_u32(ctr_u32, seed_u32):
    """One-multiply integer hash of a uint32 counter, mixed with a seed."""
    x = ctr_u32 ^ (seed_u32 * jnp.uint32(0x9E3779B9) + jnp.uint32(0x7F4A7C15))
    x = x ^ (x >> jnp.uint32(16))
    x = x * jnp.uint32(0x7FEB352D)      # single 32-bit multiply (VPU-friendly)
    x = x ^ (x >> jnp.uint32(15))
    x = x ^ (x >> jnp.uint32(12))
    return x


def _bits_to_actions(bits_u32, n_actions):
    """Map uint32 bits to int32 in [0, n_actions) without integer modulo."""
    u24 = (bits_u32 >> jnp.uint32(8)).astype(jnp.float32)   # top 24 bits, exact f32
    scale = jnp.float32(n_actions * (2.0 ** -24))
    return (u24 * scale).astype(jnp.int32)


# ---------------------------------------------------------------------------
# Kernel: fill one (8, block_lanes) tile of actions.
# ---------------------------------------------------------------------------
def _random_agent_kernel(seed_ref, actions_ref, *, n_actions, total_lanes,
                         block_lanes):
    shape = actions_ref.shape                       # (8, block_lanes)

    sub = lax.broadcasted_iota(jnp.int32, shape, 0)   # sublane index
    lane = lax.broadcasted_iota(jnp.int32, shape, 1)  # lane index within block
    base = pl.program_id(0) * block_lanes             # lane offset of this block

    # ctr == final row-major flat index of the element in the (8, total_lanes)
    # output, so wrapper flatten order and the per-element counter agree.
    ctr = (sub * jnp.int32(total_lanes) + (base + lane)).astype(jnp.uint32)

    seed = seed_ref[0].astype(jnp.uint32)
    bits = _hash_u32(ctr, seed)
    actions_ref[...] = _bits_to_actions(bits, n_actions)


# ---------------------------------------------------------------------------
# Wrapper.
# ---------------------------------------------------------------------------
def random_agent_forward(adj, *, n_actions, seed=0, min_pallas_count=4096):
    """Pallas implementation of RandomAgent.forward.

    Args:
      adj: observation array.  Its values are never read (matching the
           reference); only the static shape is used.
      n_actions: size of the Discrete action space (must be <= 2**24).
      seed: PRNG seed; same seed -> same samples.  Advance per call for fresh
            randomness.
      min_pallas_count: below this count, a pure-jnp fast path is used (the
            Pallas launch + relayout overhead dominates tiny RL batches).

    Returns:
      (actions, logp): int32[count] in [0, n_actions), float32[count] all-NaN.
    """
    assert n_actions <= (1 << 24), "range reduction assumes n_actions <= 2^24"

    # input_size = product of observation_space.shape (everything but batch).
    input_size = 1
    for d in adj.shape[1:]:
        input_size *= d
    count = adj.size // input_size          # adj.view(-1, input_size).shape[0]

    seed_u32 = jnp.asarray(seed).astype(jnp.uint32)
    logp = jnp.full((count,), jnp.nan, dtype=jnp.float32)   # constant fill: wrapper

    # ----- small-count fast path: pure XLA, no pallas_call launch ----------
    if count < min_pallas_count:
        ctr = jnp.arange(count, dtype=jnp.uint32)
        actions = _bits_to_actions(_hash_u32(ctr, seed_u32), n_actions)
        return actions, logp

    # ----- Pallas path: lane-dense (8, lanes) tile, tiled over lanes -------
    LANE_BLOCK = 16384      # (8, 16384) int32 block = 512 KiB (x2 buffers) per step
    lanes = max(128, pl.cdiv(pl.cdiv(count, 8), 128) * 128)
    if lanes > LANE_BLOCK:
        lanes = pl.cdiv(lanes, LANE_BLOCK) * LANE_BLOCK
        block_lanes = LANE_BLOCK
    else:
        block_lanes = lanes
    num_blocks = lanes // block_lanes
    pad = 8 * lanes

    seed_arr = jnp.asarray(seed, dtype=jnp.int32).reshape((1,))

    kernel = functools.partial(
        _random_agent_kernel,
        n_actions=n_actions,
        total_lanes=lanes,
        block_lanes=block_lanes,
    )

    actions_tile = pl.pallas_call(
        kernel,
        out_shape=jax.ShapeDtypeStruct((8, lanes), jnp.int32),
        grid_spec=pltpu.PrefetchScalarGridSpec(
            num_scalar_prefetch=1,                   # seed -> SMEM
            grid=(num_blocks,),
            in_specs=[],
            out_specs=pl.BlockSpec((8, block_lanes), lambda j, seed_ref: (0, j)),
        ),
        compiler_params=pltpu.CompilerParams(
            dimension_semantics=("parallel",),       # shards across v7x's 2 TCs
        ),
        cost_estimate=pl.CostEstimate(
            flops=10 * pad, transcendentals=0, bytes_accessed=4 * pad + 4
        ),
    )(seed_arr)

    # Row-major reshape of a (8, lanes) row-major HBM array is a bitcast; the
    # slice copies only `count` elements (ctr == flat index by construction).
    actions = actions_tile.reshape(pad)[:count]
    return actions, logp


if __name__ == "__main__":
    key = jax.random.PRNGKey(0)
    # Small NCHW observation batch: B=2, C=4, H=W=16.
    x = jax.random.normal(key, (2, 4, 16, 16), dtype=jnp.float32)
    n_actions = 6  # synthetic Discrete(6) action space
    count = x.shape[0]

    # 1) Force the Pallas kernel even at tiny count (correctness of the kernel).
    actions, logp = random_agent_forward(
        x, n_actions=n_actions, seed=0, min_pallas_count=0)
    actions = jax.block_until_ready(actions)
    logp = jax.block_until_ready(logp)
    assert actions.shape == (count,) and actions.dtype == jnp.int32
    assert logp.shape == (count,) and logp.dtype == jnp.float32
    assert bool(jnp.all((actions >= 0) & (actions < n_actions)))
    assert bool(jnp.all(jnp.isnan(logp)))

    # 2) Default path (small-count fast path) must agree with the kernel.
    actions_fast, logp_fast = random_agent_forward(x, n_actions=n_actions, seed=0)
    assert bool(jnp.all(actions_fast == actions))
    assert bool(jnp.all(jnp.isnan(logp_fast)))

    # 3) Larger flat observation exercises the tiled, parallel grid path.
    big = jnp.zeros((200_000, 4), dtype=jnp.float32)
    big_actions, big_logp = random_agent_forward(big, n_actions=n_actions, seed=7)
    big_actions = jax.block_until_ready(big_actions)
    assert big_actions.shape == (200_000,) and big_actions.dtype == jnp.int32
    assert bool(jnp.all((big_actions >= 0) & (big_actions < n_actions)))
    assert big_logp.shape == (200_000,)
    assert bool(jnp.all(jnp.isnan(big_logp)))

    print("KERNEL_OK")
</pallas_src>

<mosaic_0001>
module attributes {stable_mosaic.version = 11 : i64} {
  func.func @_random_agent_kernel(%arg0: i32, %arg1: memref<1xi32, #tpu.memory_space<smem>>, %arg2: memref<8x128xi32, #tpu.memory_space<vmem>>) attributes {dimension_semantics = [#tpu.dimension_semantics<parallel>], iteration_bounds = array<i64: 1>, scalar_prefetch = 1 : i64, scratch_operands = 0 : i64, tpu.core_type = #tpu.core_type<tc>, window_params = [{transform_indices = @transform_0, window_bounds = array<i64: 8, 128>}]} {
    %0 = tpu.iota {dimensions = array<i32: 0>} : vector<8x128xi32>
    %1 = tpu.iota {dimensions = array<i32: 1>} : vector<8x128xi32>
    %c128_i32 = arith.constant 128 : i32
    %2 = arith.muli %arg0, %c128_i32 : i32
    %c128_i32_0 = arith.constant 128 : i32
    %3 = vector.broadcast %c128_i32_0 : i32 to vector<8x128xi32>
    %4 = arith.muli %0, %3 : vector<8x128xi32>
    %5 = vector.broadcast %2 : i32 to vector<8x128xi32>
    %6 = arith.addi %5, %1 : vector<8x128xi32>
    %7 = arith.addi %4, %6 : vector<8x128xi32>
    %c0 = arith.constant 0 : index
    %8 = memref.load %arg1[%c0] : memref<1xi32, #tpu.memory_space<smem>>
    %c-1640531527_i32 = arith.constant -1640531527 : i32
    %9 = arith.muli %8, %c-1640531527_i32 : i32
    %c2135587861_i32 = arith.constant 2135587861 : i32
    %10 = arith.addi %9, %c2135587861_i32 : i32
    %11 = vector.broadcast %10 : i32 to vector<8x128xi32>
    %12 = arith.xori %7, %11 : vector<8x128xi32>
    %c16_i32 = arith.constant 16 : i32
    %13 = vector.broadcast %c16_i32 : i32 to vector<8x128xi32>
    %14 = arith.shrui %12, %13 : vector<8x128xi32>
    %15 = arith.xori %12, %14 : vector<8x128xi32>
    %c2146121005_i32 = arith.constant 2146121005 : i32
    %16 = vector.broadcast %c2146121005_i32 : i32 to vector<8x128xi32>
    %17 = arith.muli %15, %16 : vector<8x128xi32>
    %c15_i32 = arith.constant 15 : i32
    %18 = vector.broadcast %c15_i32 : i32 to vector<8x128xi32>
    %19 = arith.shrui %17, %18 : vector<8x128xi32>
    %20 = arith.xori %17, %19 : vector<8x128xi32>
    %c12_i32 = arith.constant 12 : i32
    %21 = vector.broadcast %c12_i32 : i32 to vector<8x128xi32>
    %22 = arith.shrui %20, %21 : vector<8x128xi32>
    %23 = arith.xori %20, %22 : vector<8x128xi32>
    %c8_i32 = arith.constant 8 : i32
    %24 = vector.broadcast %c8_i32 : i32 to vector<8x128xi32>
    %25 = arith.shrui %23, %24 : vector<8x128xi32>
    %26 = arith.uitofp %25 : vector<8x128xi32> to vector<8x128xf32>
    %cst = arith.constant 3.57627869E-7 : f32
    %27 = vector.broadcast %cst : f32 to vector<8x128xf32>
    %28 = arith.mulf %26, %27 : vector<8x128xf32>
    %29 = arith.fptosi %28 : vector<8x128xf32> to vector<8x128xi32>
    %c0_1 = arith.constant 0 : index
    %c0_2 = arith.constant 0 : index
    %30 = vector.load %arg2[%c0_1, %c0_2] : memref<8x128xi32, #tpu.memory_space<vmem>>, vector<8x128xi32>
    tpu.vector_store %arg2[%c0_1, %c0_2], %29 {strides = array<i32>} : memref<8x128xi32, #tpu.memory_space<vmem>>, vector<8x128xi32>,
    return
  }
  func.func @transform_0(%arg0: i32, %arg1: memref<1xi32, #tpu.memory_space<smem>>) -> (i32, i32) {
    %c0_i32 = arith.constant 0 : i32
    %c0_i32_0 = arith.constant 0 : i32
    return %c0_i32, %arg0 : i32, i32
  }
}

</mosaic_0001>

<bundles_post_ra>
// kernel: tpu_custom_call.1
= control target key start
LH: loop header
LB: loop body
LE: loop exit
PB: predicated region body
PF: predicated region fallthrough
CT: control target
= control target key end

     0   :  { %v8_v0 = vlaneseq  ;;  %s104_s0 = inlined_call_operand.<no memory space> [shape: s32[1], index: 0, kind: input, shape index: {}]   ;;  %s105_s1 = inlined_call_operand.hbm [shape: s32[8,128], index: 1, kind: output, shape index: {}]  }
   0x1   :  { %s18_s8 = smul.u32 2654435769, %s104_s0 }
   0x2   :  { %7 = vsyncpa [#allocation5], 0  ;;  %v9_v1 = vshrl.u32 %v8_v0, 7  ;;  %v11_v2 = vand.u32 127, %v8_v0  ;;  %s87_s0 = smov [#allocation4]   ;;  %s46_s13 = sshll.u32 %s105_s1, 4  ;;  %s47_s13 = int_to_ptr.hbm [resolvable:$true] %s46_s13 }
   0x3   :  { %s19_s9 = sadd.s32 2135587861, %s18_s8  ;;  %s44_s10 = sshll.u32 %s87_s0, 4  ;;  %s45_s10 = int_to_ptr.vmem [resolvable:$true] %s44_s10 }
   0x4   :  { %v13_v3 = vmul.u32 128, %v9_v1  ;;  %v20_v4 = vstv %s19_s9 }
   0x6   :  { %v16_v5 = vadd.s32 %v13_v3, %v11_v2 }
   0x8   :  { %v21_v6 = vxor.u32 %v20_v4, %v16_v5 }
   0xa   :  { %v22_v7 = vshrl.u32 %v21_v6, 16 }
   0xc   :  { %v23_v8 = vxor.u32 %v22_v7, %v21_v6 }
   0xe   :  { %v24_v9 = vmul.u32 2146121005, %v23_v8 }
  0x10   :  { %v25_v10 = vshrl.u32 %v24_v9, 15 }
  0x12   :  { %v26_v11 = vxor.u32 %v25_v10, %v24_v9 }
  0x14   :  { %v27_v12 = vshrl.u32 %v26_v11, 12 }
  0x16   :  { %v28_v13 = vxor.u32 %v27_v12, %v26_v11 }
  0x18   :  { %v29_v14 = vshrl.u32 %v28_v13, 8 }
  0x1a   :  { %v30_v15 = vshrl.u32 %v29_v14, 16  ;;  %v31_v16 = vand.u32 65535, %v29_v14 }
  0x1c   :  { %v32_v17 = vcvt.s32.f32 %v30_v15  ;;  %v34_v18 = vcvt.s32.f32 %v31_v16 }
  0x1e   :  { %v33_v19 = vmul.f32 65536.0, %v32_v17 }
  0x20   :  { %v35_v20 = vadd.f32 %v34_v18, %v33_v19 }
  0x22   :  { %v36_v21 = vmul.f32 3.5762787e-07, %v35_v20 }
  0x24   :  { %vm55_vm0 = vcmp.lt.s32.totalorder %v36_v21, 0  ;;  %v56_v22 = vceil.f32 %v36_v21  ;;  %v57_v23 = vfloor.f32 %v36_v21 }
  0x26   :  { %v58_v24 = vsel %vm55_vm0, %v56_v22, %v57_v23 }
  0x27   :  { %v59_v25 = vcvt.f32.s32 %v58_v24 }
  0x29   :  { %38 = vst [vmem:[#allocation4] sm:$0xff] %v59_v25 }
  0x2a   :  { %49 = dma.vmem_to_hbm [thread:$0]  %s45_s10, 128, %s47_s13, [#allocation5]  }
  0x2b   :  { %85 = dma.done.wait [#allocation5], 128  }
  0x2c   :  { %86 = vsyncadd [#allocation5], 4294967168 }
  0x2d   :  { %54 = vsyncpa [#allocation5], 1 }

</bundles_post_ra>
